<compile_context>
chip_gen: v7x
topology: tpu7x:2x2x1
jax: 0.10.0
libtpu: 0.0.40
codegen_flags: <defaults>
</compile_context>

<pallas_src>
import functools

import numpy as np
import jax
import jax.numpy as jnp
from jax import lax
from jax.experimental import pallas as pl
from jax.experimental.pallas import tpu as pltpu

# ----------------- config (mirrors Sins.__init__ arguments) -----------------
SAMPLING_RATE = 16000
BLOCK_SIZE = 128
WIN_LENGTH = 256
USE_MEAN_FILTER = False            # -> mean_kernel_size = 1, mean_filter skipped
N_HARMONICS = 64
N_MAG_NOISE = 32
N_MELS = 32
HIDDEN = 64                        # Mel2Control hidden width (stand-in)

SPLIT_MAP = {
    "amplitudes": N_HARMONICS,
    "harmonic_phase": WIN_LENGTH // 2 + 1,
    "noise_magnitude": N_MAG_NOISE,
    "noise_phase": N_MAG_NOISE,
}
N_OUT = sum(SPLIT_MAP.values())    # 257

# lane-dense padded sizes for the kernel
H_PAD = 128                            # HIDDEN 64 -> 128
K_PACK = 2 * BLOCK_SIZE + N_MELS       # [sin(128) | noise(128) | mel(32)] = 288
N_OUT_PAD = 384                        # 257 -> 3 x 128


def _round_up(x, m):
    return ((x + m - 1) // m) * m


def _pick_tile_m(rows):
    # Big tiles amortize the ~0.35 us per-grid-step overhead; keep >=2 grid steps
    # where possible so both v7x TensorCores get work via the "parallel" axis.
    # Per-step VMEM at tile_m=512 is only a few MB (safe even on v7x's 64 MiB VMEM).
    if rows >= 1024:
        return 512
    if rows >= 512:
        return 256
    if rows >= 128:
        return 128
    return _round_up(max(rows, 8), 8)


def _use_bf16_eup():
    # bf16 VPU/EUP exists on v6e and later; v5e (and older) lack it, and the CPU
    # interpret path just uses f32.
    try:
        dev = jax.devices()[0]
        if dev.platform != "tpu":
            return False
        kind = dev.device_kind.lower()
        return not any(v in kind for v in ("v2", "v3", "v4", "v5"))
    except Exception:
        return False


# -------------------------- fused Sins forward kernel ------------------------
def _sins_fused_kernel(pp_ref, mel_ref, noise_ref, w1_ref, b1_ref, w2_ref, b2_ref,
                       out_ref, xcat_ref, *, tanh_bf16):
    tile_m = out_ref.shape[0]
    bs = BLOCK_SIZE

    # per-row phase scalars, lane-sliced from the contiguous (tile_m, 3) block
    s0 = pp_ref[:, 0:1]       # (tile_m, 1)
    ds0 = pp_ref[:, 1:2]      # (tile_m, 1)
    r_off = pp_ref[:, 2:3]    # (tile_m, 1)

    # ---- sinusoid block: sin(2*pi*(s0*(n+1) + 0.5*ds0*n*(n+1)/bs + rad_off)) ----
    n = lax.broadcasted_iota(jnp.int32, (tile_m, bs), 1).astype(jnp.float32)
    rad = s0 * (n + 1.0) + (0.5 / bs) * ds0 * (n * (n + 1.0)) + r_off
    rad = rad - jnp.floor(rad)            # cheap VPU wrap -> tighter f32 sin accuracy
    sin_blk = jnp.sin((2.0 * np.pi) * rad)

    # ---- pack [sin | noise | mel] into one lane-aligned K=288 bf16 slab ----
    # (all 288 columns are written every step; scratch never holds stale data)
    xcat_ref[:, 0:bs] = sin_blk.astype(jnp.bfloat16)
    xcat_ref[:, bs:2 * bs] = noise_ref[...]                  # bf16 from wrapper
    xcat_ref[:, 2 * bs:2 * bs + N_MELS] = mel_ref[...]       # bf16, 32 channels

    # ---- fused Mel2Control stand-in: K=288 matmul, tanh, output head ----
    # TODO(synk): the real Mel2Control (conv stack + PCmer transformer) is not in the
    # provided snippet; this keeps its I/O contract as linear embeddings + tanh + head.
    h = jnp.dot(xcat_ref[...], w1_ref[...], preferred_element_type=jnp.float32)
    h = h + b1_ref[...]
    if tanh_bf16:
        h = jnp.tanh(h.astype(jnp.bfloat16))                 # bf16 EUP on v6e/v7x
    else:
        h = jnp.tanh(h).astype(jnp.bfloat16)                 # f32 EUP (v5e / interpret)
    out = jnp.dot(h, w2_ref[...], preferred_element_type=jnp.float32)
    out_ref[...] = out + b2_ref[...]


def split_to_dict(out_flat):
    d, start = {}, 0
    for k, v in SPLIT_MAP.items():
        d[k] = out_flat[..., start:start + v]
        start += v
    return d


# ------------------------------- forward ------------------------------------
def sins_forward(mel_frames, f0_frames, params, noise_key):
    """
    mel_frames: (B, T, N_MELS) float32
    f0_frames : (B, T, 1)      float32
    returns (amplitudes, harmonic_phase, noise_magnitude, noise_phase)
    """
    B, T, _ = f0_frames.shape
    rows = B * T

    # ---- tiny per-frame phase glue (fast_phase_gen frame recursion), plain JAX ----
    s0 = (f0_frames / SAMPLING_RATE).astype(jnp.float32)                       # (B,T,1)
    ds0 = jnp.pad(s0[:, 1:, :] - s0[:, :-1, :], ((0, 0), (0, 1), (0, 0)))      # (B,T,1)
    rad_last = s0 * BLOCK_SIZE + 0.5 * ds0 * (BLOCK_SIZE - 1.0)                # rad @ n=bs-1
    rad2 = jnp.fmod(rad_last + 0.5, 1.0) - 0.5
    rad_acc = jnp.fmod(jnp.cumsum(rad2, axis=1), 1.0)
    rad_off = jnp.pad(rad_acc[:, :-1, :], ((0, 0), (1, 0), (0, 0)))            # (B,T,1)

    tile_m = _pick_tile_m(rows)
    rows_pad = _round_up(rows, tile_m)

    # packed per-row phase scalars, lane-contiguous: (rows_pad, 3) f32
    pp = jnp.concatenate([s0, ds0, rad_off], axis=-1).reshape(rows, 3)
    pp = jnp.pad(pp, ((0, rows_pad - rows), (0, 0)))

    # mel stays 32 channels (no HBM padding), bf16, flattened + row-padded
    mel = mel_frames.astype(jnp.bfloat16).reshape(rows, N_MELS)
    mel = jnp.pad(mel, ((0, rows_pad - rows), (0, 0)))

    # Gaussian noise drawn once in the wrapper (torch.randn_like equivalent),
    # streamed to the kernel as bf16.
    noise = jax.random.normal(noise_key, (rows_pad, BLOCK_SIZE),
                              dtype=jnp.float32).astype(jnp.bfloat16)

    grid = (rows_pad // tile_m,)
    kern = functools.partial(_sins_fused_kernel, tanh_bf16=_use_bf16_eup())

    out_flat = pl.pallas_call(
        kern,
        out_shape=jax.ShapeDtypeStruct((rows_pad, N_OUT_PAD), jnp.float32),
        grid_spec=pltpu.PrefetchScalarGridSpec(
            num_scalar_prefetch=0,
            grid=grid,
            in_specs=[
                pl.BlockSpec((tile_m, 3), lambda i: (i, 0)),                # phase scalars
                pl.BlockSpec((tile_m, N_MELS), lambda i: (i, 0)),           # mel (bf16, 32ch)
                pl.BlockSpec((tile_m, BLOCK_SIZE), lambda i: (i, 0)),       # noise (bf16)
                pl.BlockSpec((K_PACK, H_PAD), lambda i: (0, 0)),            # fused W1 (bf16)
                pl.BlockSpec((1, H_PAD), lambda i: (0, 0)),                 # b1 (f32)
                pl.BlockSpec((H_PAD, N_OUT_PAD), lambda i: (0, 0)),         # W2 (bf16)
                pl.BlockSpec((1, N_OUT_PAD), lambda i: (0, 0)),             # b2 (f32)
            ],
            out_specs=pl.BlockSpec((tile_m, N_OUT_PAD), lambda i: (i, 0)),
            scratch_shapes=[pltpu.VMEM((tile_m, K_PACK), jnp.bfloat16)],
        ),
        compiler_params=pltpu.CompilerParams(dimension_semantics=("parallel",)),
    )(pp, mel, noise, params["w1"], params["b1"], params["w2"], params["b2"])

    out = out_flat[:rows, :N_OUT].reshape(B, T, N_OUT)
    ctrls = split_to_dict(out)
    # TODO(synk): mean_filter() definition not in provided snippet; this script uses
    # use_mean_filter=False (mean_kernel_size == 1), so it is skipped.
    return (ctrls["amplitudes"], ctrls["harmonic_phase"],
            ctrls["noise_magnitude"], ctrls["noise_phase"])


def init_params(key):
    ks = jax.random.split(key, 4)

    def w(k, shape, fan_in):
        return jax.random.normal(k, shape, dtype=jnp.float32) / np.sqrt(fan_in)

    # logical (unpadded) Mel2Control stand-in weights
    ws = w(ks[0], (BLOCK_SIZE, HIDDEN), BLOCK_SIZE)     # sinusoid embed
    wn = w(ks[1], (BLOCK_SIZE, HIDDEN), BLOCK_SIZE)     # noise embed
    wm = w(ks[2], (N_MELS, HIDDEN), N_MELS)             # mel embed
    b = jnp.zeros((HIDDEN,), jnp.float32)
    wo = w(ks[3], (HIDDEN, N_OUT), HIDDEN)
    bo = jnp.zeros((N_OUT,), jnp.float32)

    # fuse + zero-pad into kernel weights; matmul operands in bf16, biases f32.
    w1 = jnp.zeros((K_PACK, H_PAD), jnp.float32)
    w1 = w1.at[0:BLOCK_SIZE, :HIDDEN].set(ws)                            # sinusoid slab
    w1 = w1.at[BLOCK_SIZE:2 * BLOCK_SIZE, :HIDDEN].set(wn)               # noise slab
    w1 = w1.at[2 * BLOCK_SIZE:2 * BLOCK_SIZE + N_MELS, :HIDDEN].set(wm)  # mel slab
    b1 = jnp.zeros((1, H_PAD), jnp.float32).at[0, :HIDDEN].set(b)
    w2 = jnp.zeros((H_PAD, N_OUT_PAD), jnp.float32).at[:HIDDEN, :N_OUT].set(wo)
    b2 = jnp.zeros((1, N_OUT_PAD), jnp.float32).at[0, :N_OUT].set(bo)

    return dict(w1=w1.astype(jnp.bfloat16), b1=b1,
                w2=w2.astype(jnp.bfloat16), b2=b2)


if __name__ == "__main__":
    key = jax.random.PRNGKey(0)
    kp, km, kf, kn = jax.random.split(key, 4)

    B, T = 2, 8
    params = init_params(kp)
    mel_frames = jax.random.normal(km, (B, T, N_MELS), dtype=jnp.float32)
    f0_frames = 100.0 + 300.0 * jax.random.uniform(kf, (B, T, 1), dtype=jnp.float32)

    outs = sins_forward(mel_frames, f0_frames, params, kn)
    outs = jax.block_until_ready(outs)

    assert outs[0].shape == (B, T, N_HARMONICS)
    assert outs[1].shape == (B, T, WIN_LENGTH // 2 + 1)
    assert outs[2].shape == (B, T, N_MAG_NOISE)
    assert outs[3].shape == (B, T, N_MAG_NOISE)
    assert all(o.dtype == jnp.float32 for o in outs)
    assert all(bool(jnp.all(jnp.isfinite(o))) for o in outs)
    print("KERNEL_OK")
</pallas_src>

<mosaic_0001>
module attributes {stable_mosaic.version = 11 : i64} {
  func.func @_sins_fused_kernel(%arg0: i32, %arg1: memref<16x3xf32, #tpu.memory_space<vmem>>, %arg2: memref<16x32xbf16, #tpu.memory_space<vmem>>, %arg3: memref<16x128xbf16, #tpu.memory_space<vmem>>, %arg4: memref<288x128xbf16, #tpu.memory_space<vmem>>, %arg5: memref<1x128xf32, #tpu.memory_space<vmem>>, %arg6: memref<128x384xbf16, #tpu.memory_space<vmem>>, %arg7: memref<1x384xf32, #tpu.memory_space<vmem>>, %arg8: memref<16x384xf32, #tpu.memory_space<vmem>>, %arg9: memref<16x288xbf16, #tpu.memory_space<vmem>>) attributes {dimension_semantics = [#tpu.dimension_semantics<parallel>], iteration_bounds = array<i64: 1>, scalar_prefetch = 0 : i64, scratch_operands = 1 : i64, tpu.core_type = #tpu.core_type<tc>, window_params = [{transform_indices = @transform_0, window_bounds = array<i64: 16, 3>}, {transform_indices = @transform_1, window_bounds = array<i64: 16, 32>}, {transform_indices = @transform_2, window_bounds = array<i64: 16, 128>}, {pipeline_mode = #tpu.pipeline_mode<synchronous>, transform_indices = @transform_3, window_bounds = array<i64: 288, 128>}, {pipeline_mode = #tpu.pipeline_mode<synchronous>, transform_indices = @transform_4, window_bounds = array<i64: 1, 128>}, {pipeline_mode = #tpu.pipeline_mode<synchronous>, transform_indices = @transform_5, window_bounds = array<i64: 128, 384>}, {pipeline_mode = #tpu.pipeline_mode<synchronous>, transform_indices = @transform_6, window_bounds = array<i64: 1, 384>}, {transform_indices = @transform_7, window_bounds = array<i64: 16, 384>}]} {
    %c0 = arith.constant 0 : index
    %c0_0 = arith.constant 0 : index
    %0 = vector.load %arg1[%c0, %c0_0] : memref<16x3xf32, #tpu.memory_space<vmem>>, vector<16x1xf32>
    %c0_1 = arith.constant 0 : index
    %c1 = arith.constant 1 : index
    %1 = vector.load %arg1[%c0_1, %c1] : memref<16x3xf32, #tpu.memory_space<vmem>>, vector<16x1xf32>
    %c0_2 = arith.constant 0 : index
    %c2 = arith.constant 2 : index
    %2 = vector.load %arg1[%c0_2, %c2] : memref<16x3xf32, #tpu.memory_space<vmem>>, vector<16x1xf32>
    %3 = tpu.iota {dimensions = array<i32: 1>} : vector<16x128xi32>
    %4 = arith.sitofp %3 : vector<16x128xi32> to vector<16x128xf32>
    %cst = arith.constant 1.000000e+00 : f32
    %5 = vector.broadcast %cst : f32 to vector<16x128xf32>
    %6 = arith.addf %4, %5 : vector<16x128xf32>
    %7 = vector.broadcast %0 : vector<16x1xf32> to vector<16x128xf32>
    %8 = arith.mulf %7, %6 : vector<16x128xf32>
    %cst_3 = arith.constant 3.906250e-03 : f32
    %9 = vector.broadcast %cst_3 : f32 to vector<16x1xf32>
    %10 = arith.mulf %9, %1 : vector<16x1xf32>
    %cst_4 = arith.constant 1.000000e+00 : f32
    %11 = vector.broadcast %cst_4 : f32 to vector<16x128xf32>
    %12 = arith.addf %4, %11 : vector<16x128xf32>
    %13 = arith.mulf %4, %12 : vector<16x128xf32>
    %14 = vector.broadcast %10 : vector<16x1xf32> to vector<16x128xf32>
    %15 = arith.mulf %14, %13 : vector<16x128xf32>
    %16 = arith.addf %8, %15 : vector<16x128xf32>
    %17 = vector.broadcast %2 : vector<16x1xf32> to vector<16x128xf32>
    %18 = arith.addf %16, %17 : vector<16x128xf32>
    %19 = math.floor %18 : vector<16x128xf32>
    %20 = arith.subf %18, %19 : vector<16x128xf32>
    %cst_5 = arith.constant 6.28318548 : f32
    %21 = vector.broadcast %cst_5 : f32 to vector<16x128xf32>
    %22 = arith.mulf %21, %20 : vector<16x128xf32>
    %23 = math.sin %22 : vector<16x128xf32>
    %24 = arith.truncf %23 : vector<16x128xf32> to vector<16x128xbf16>
    %c0_6 = arith.constant 0 : index
    %c0_7 = arith.constant 0 : index
    %25 = vector.load %arg9[%c0_6, %c0_7] : memref<16x288xbf16, #tpu.memory_space<vmem>>, vector<16x128xbf16>
    tpu.vector_store %arg9[%c0_6, %c0_7], %24 {strides = array<i32>} : memref<16x288xbf16, #tpu.memory_space<vmem>>, vector<16x128xbf16>,
    %c0_8 = arith.constant 0 : index
    %c0_9 = arith.constant 0 : index
    %26 = vector.load %arg3[%c0_8, %c0_9] : memref<16x128xbf16, #tpu.memory_space<vmem>>, vector<16x128xbf16>
    %c0_10 = arith.constant 0 : index
    %c128 = arith.constant 128 : index
    %27 = vector.load %arg9[%c0_10, %c128] : memref<16x288xbf16, #tpu.memory_space<vmem>>, vector<16x128xbf16>
    tpu.vector_store %arg9[%c0_10, %c128], %26 {strides = array<i32>} : memref<16x288xbf16, #tpu.memory_space<vmem>>, vector<16x128xbf16>,
    %c0_11 = arith.constant 0 : index
    %c0_12 = arith.constant 0 : index
    %28 = vector.load %arg2[%c0_11, %c0_12] : memref<16x32xbf16, #tpu.memory_space<vmem>>, vector<16x32xbf16>
    %c0_13 = arith.constant 0 : index
    %c256 = arith.constant 256 : index
    %29 = vector.load %arg9[%c0_13, %c256] : memref<16x288xbf16, #tpu.memory_space<vmem>>, vector<16x32xbf16>
    tpu.vector_store %arg9[%c0_13, %c256], %28 {strides = array<i32>} : memref<16x288xbf16, #tpu.memory_space<vmem>>, vector<16x32xbf16>,
    %c0_14 = arith.constant 0 : index
    %c0_15 = arith.constant 0 : index
    %30 = vector.load %arg9[%c0_14, %c0_15] : memref<16x288xbf16, #tpu.memory_space<vmem>>, vector<16x288xbf16>
    %c0_16 = arith.constant 0 : index
    %c0_17 = arith.constant 0 : index
    %31 = vector.load %arg4[%c0_16, %c0_17] : memref<288x128xbf16, #tpu.memory_space<vmem>>, vector<288x128xbf16>
    %cst_18 = arith.constant dense<0.000000e+00> : vector<16x128xf32>
    %32 = tpu.matmul %30, %31, %cst_18 {dimension_numbers = #tpu.dot_dimension_numbers<[1], [0], [0], [1], [0, 0, 1, 1], [], []>} : vector<16x288xbf16>, vector<288x128xbf16>, vector<16x128xf32> -> vector<16x128xf32>
    %c0_19 = arith.constant 0 : index
    %c0_20 = arith.constant 0 : index
    %33 = vector.load %arg5[%c0_19, %c0_20] : memref<1x128xf32, #tpu.memory_space<vmem>>, vector<1x128xf32>
    %34 = vector.broadcast %33 : vector<1x128xf32> to vector<16x128xf32>
    %35 = arith.addf %32, %34 : vector<16x128xf32>
    %36 = math.tanh %35 : vector<16x128xf32>
    %37 = arith.truncf %36 : vector<16x128xf32> to vector<16x128xbf16>
    %c0_21 = arith.constant 0 : index
    %c0_22 = arith.constant 0 : index
    %38 = vector.load %arg6[%c0_21, %c0_22] : memref<128x384xbf16, #tpu.memory_space<vmem>>, vector<128x384xbf16>
    %cst_23 = arith.constant dense<0.000000e+00> : vector<16x384xf32>
    %39 = tpu.matmul %37, %38, %cst_23 {dimension_numbers = #tpu.dot_dimension_numbers<[1], [0], [0], [1], [0, 0, 1, 1], [], []>} : vector<16x128xbf16>, vector<128x384xbf16>, vector<16x384xf32> -> vector<16x384xf32>
    %c0_24 = arith.constant 0 : index
    %c0_25 = arith.constant 0 : index
    %40 = vector.load %arg7[%c0_24, %c0_25] : memref<1x384xf32, #tpu.memory_space<vmem>>, vector<1x384xf32>
    %41 = vector.broadcast %40 : vector<1x384xf32> to vector<16x384xf32>
    %42 = arith.addf %39, %41 : vector<16x384xf32>
    %c0_26 = arith.constant 0 : index
    %c0_27 = arith.constant 0 : index
    %43 = vector.load %arg8[%c0_26, %c0_27] : memref<16x384xf32, #tpu.memory_space<vmem>>, vector<16x384xf32>
    tpu.vector_store %arg8[%c0_26, %c0_27], %42 {strides = array<i32>} : memref<16x384xf32, #tpu.memory_space<vmem>>, vector<16x384xf32>,
    return
  }
  func.func @transform_0(%arg0: i32) -> (i32, i32) {
    %c0_i32 = arith.constant 0 : i32
    %c0_i32_0 = arith.constant 0 : i32
    return %arg0, %c0_i32 : i32, i32
  }
  func.func @transform_1(%arg0: i32) -> (i32, i32) {
    %c0_i32 = arith.constant 0 : i32
    %c0_i32_0 = arith.constant 0 : i32
    return %arg0, %c0_i32 : i32, i32
  }
  func.func @transform_2(%arg0: i32) -> (i32, i32) {
    %c0_i32 = arith.constant 0 : i32
    %c0_i32_0 = arith.constant 0 : i32
    return %arg0, %c0_i32 : i32, i32
  }
  func.func @transform_3(%arg0: i32) -> (i32, i32) {
    %c0_i32 = arith.constant 0 : i32
    %c0_i32_0 = arith.constant 0 : i32
    %c0_i32_1 = arith.constant 0 : i32
    return %c0_i32, %c0_i32_0 : i32, i32
  }
  func.func @transform_4(%arg0: i32) -> (i32, i32) {
    %c0_i32 = arith.constant 0 : i32
    %c0_i32_0 = arith.constant 0 : i32
    %c0_i32_1 = arith.constant 0 : i32
    return %c0_i32, %c0_i32_0 : i32, i32
  }
  func.func @transform_5(%arg0: i32) -> (i32, i32) {
    %c0_i32 = arith.constant 0 : i32
    %c0_i32_0 = arith.constant 0 : i32
    %c0_i32_1 = arith.constant 0 : i32
    return %c0_i32, %c0_i32_0 : i32, i32
  }
  func.func @transform_6(%arg0: i32) -> (i32, i32) {
    %c0_i32 = arith.constant 0 : i32
    %c0_i32_0 = arith.constant 0 : i32
    %c0_i32_1 = arith.constant 0 : i32
    return %c0_i32, %c0_i32_0 : i32, i32
  }
  func.func @transform_7(%arg0: i32) -> (i32, i32) {
    %c0_i32 = arith.constant 0 : i32
    %c0_i32_0 = arith.constant 0 : i32
    return %arg0, %c0_i32 : i32, i32
  }
}

</mosaic_0001>

<bundles_post_ra>
// kernel: tpu_custom_call.1
= control target key start
LH: loop header
LB: loop body
LE: loop exit
PB: predicated region body
PF: predicated region fallthrough
CT: control target
= control target key end

     0   :  { %12 = vsyncpa [#allocation4], 0  ;;  %s1354_s0 = inlined_call_operand.vmem [shape: f32[16,3], index: 0, kind: input, shape index: {}]   ;;  %s1355_s1 = inlined_call_operand.vmem [shape: bf16[16,32], index: 1, kind: input, shape index: {}]   ;;  %s1356_s2 = inlined_call_operand.vmem [shape: bf16[16,128], index: 2, kind: input, shape index: {}]   ;;  %s1357_s3 = inlined_call_operand.hbm [shape: bf16[288,128], index: 3, kind: input, shape index: {}]   ;;  %s1358_s4 = inlined_call_operand.vmem [shape: f32[1,128], index: 4, kind: input, shape index: {}]   ;;  %s1359_s5 = inlined_call_operand.hbm [shape: bf16[128,384], index: 5, kind: input, shape index: {}]   ;;  %s1360_s6 = inlined_call_operand.vmem [shape: f32[1,384], index: 6, kind: input, shape index: {}]   ;;  %s1361_s7 = inlined_call_operand.hbm [shape: f32[16,384], index: 7, kind: output, shape index: {}]  }
   0x1   :  { %13 = vsyncpa [#allocation7], 0 }
   0x2   :  { %14 = vsyncpa [#allocation5], 0  ;;  %s1147_s24 = smov [#allocation3]   ;;  %s1075_s28 = scalar_lea.hbm %s1357_s3, 2304 }
   0x3   :  { %s26_s25 = sshll.u32 %s1147_s24, 4  ;;  %p1076_p0 = scmp.ne.s32.totalorder %s1357_s3, %s1075_s28  ;;  %s27_s25 = int_to_ptr.vmem [resolvable:$true] %s26_s25 }
   0x4   :  { %p1079_p1 = scmp.lt.u32.totalorder %s1075_s28, %s1357_s3 }
   0x6   :  { %p1081_p2 = pnand %p1079_p1, %p1076_p0 }
   0x8   :  { %1084 = shalt.err (!%p1081_p2)
}
   0x9   :  { %s1085_s10 = scalar_lea.vmem %s27_s25, 2304  ;;  %p1090_p4 = scmp.lt.s32.totalorder %s27_s25, %s27_s25 }
   0xa   :  { %p1086_p3 = scmp.ne.s32.totalorder %s27_s25, %s1085_s10  ;;  %p1091_p5 = scmp.lt.s32.totalorder %s1085_s10, %s1085_s10 }
   0xc   :  { %p1092_p6 = por %p1091_p5, %p1090_p4 }
   0xe   :  { %p1093_p7 = pnand %p1092_p6, %p1086_p3 }
  0x10   :  { %1096 = shalt.err (!%p1093_p7)
}
  0x11   :  { %s1148_s11 = smov 64   ;;  %s1149_s12 = smov 4  }
  0x12   :  { %32 = dma.hbm_to_vmem [thread:$0]  %s1357_s3, 2304, %s27_s25, [#allocation4], %s1148_s11, %s1148_s11, %s1149_s12  }
  0x13   :  { %s1150_s15 = smov [#allocation6]   ;;  %s1097_s19 = scalar_lea.hbm %s1359_s5, 3072 }
  0x14   :  { %s40_s16 = sshll.u32 %s1150_s15, 4  ;;  %p1098_p8 = scmp.ne.s32.totalorder %s1359_s5, %s1097_s19  ;;  %s41_s16 = int_to_ptr.vmem [resolvable:$true] %s40_s16 }
  0x15   :  { %p1101_p9 = scmp.lt.u32.totalorder %s1097_s19, %s1359_s5 }
  0x17   :  { %p1103_p10 = pnand %p1101_p9, %p1098_p8 }
  0x19   :  { %1106 = shalt.err (!%p1103_p10)
}
  0x1a   :  { %s1107_s24 = scalar_lea.vmem %s41_s16, 3072  ;;  %p1112_p12 = scmp.lt.s32.totalorder %s41_s16, %s41_s16 }
  0x1b   :  { %p1108_p11 = scmp.ne.s32.totalorder %s41_s16, %s1107_s24  ;;  %p1113_p13 = scmp.lt.s32.totalorder %s1107_s24, %s1107_s24 }
  0x1d   :  { %p1114_p0 = por %p1113_p13, %p1112_p12 }
  0x1f   :  { %p1115_p1 = pnand %p1114_p0, %p1108_p11 }
  0x21   :  { %1118 = shalt.err (!%p1115_p1)
}
  0x22   :  { %s1151_s3 = smov 192   ;;  %s1152_s25 = smov 12  }
  0x23   :  { %46 = dma.hbm_to_vmem [thread:$0]  %s1359_s5, 3072, %s41_s16, [#allocation7], %s1151_s3, %s1151_s3, %s1152_s25  }
  0x24   :  { %1141 = dma.done.wait [#allocation4], 2304  }
  0x25   :  { %1142 = vsyncadd [#allocation4], 4294964992 }
  0x26   :  { %1143 = dma.done.wait [#allocation7], 3072  }
  0x27   :  { %1144 = vsyncadd [#allocation7], 4294964224  ;;  %v1153_v0 = vmov 0   ;;  %v1154_v1 = vmov 1   ;;  %v56_v2 = vld [vmem:[%s1354_s0] sm:$0xff]  ;;  %v57_v3 = vld [vmem:[%s1354_s0 + $0x8] sm:$0xff]  ;;  %v58_v26 = vlaneseq }
  0x28   :  { %1007 = vset.pattern.permute.xlu0 %v1153_v0  ;;  %1008 = vset.pattern.permute.xlu1 %v1154_v1  ;;  %v74_v4 = vmul.f32 0.00390625, %v56_v2  ;;  %v75_v5 = vmul.f32 0.00390625, %v57_v3  ;;  %v1155_v6 = vmov 2   ;;  %v1011_v7 = vld [vmem:[#allocation3 + $0x40] sm:$0xff]   ;;  %v1013_v9 = vld [vmem:[#allocation3 + $0x48] sm:$0xff]   ;;  %v1015_v11 = vld [vmem:[#allocation3 + $0x50] sm:$0xff]  }
  0x29   :  { %64 = vperm.xlu0 %1007, %v56_v2   ;;  %v1012_v8 = vld [vmem:[#allocation3] sm:$0xff]   ;;  %917 = vmatprep.subr.bf16.mxu0 %v1011_v7  ;;  %v1014_v10 = vld [vmem:[#allocation3 + $0x8] sm:$0xff]   ;;  %v1016_v12 = vld [vmem:[#allocation3 + $0x10] sm:$0xff]   ;;  %vm334_vm0 = vcmask 261120   ;;  %v1156_v23 = vmov 0.0   ;;  %vm1157_vm1 = vmmov 0  }
  0x2a   :  { %79 = vperm.xlu1 %1008, %v74_v4   ;;  %918 = vmatpush3.bf16.msra.mxu0 %v1012_v8  ;;  %v1017_v13 = vld [vmem:[#allocation3 + $0x58] sm:$0xff]   ;;  %v1019_v15 = vld [vmem:[#allocation3 + $0x60] sm:$0xff]   ;;  %v1021_v17 = vld [vmem:[#allocation3 + $0x68] sm:$0xff]   ;;  %v59_v31 = vand.u32 127, %v58_v26  ;;  %s1164_s12 = smov [#allocation8]  }
  0x2b   :  { %919 = vmatprep.subr.bf16.mxu0 %v1013_v9  ;;  %v1018_v14 = vld [vmem:[#allocation3 + $0x18] sm:$0xff]   ;;  %v1020_v16 = vld [vmem:[#allocation3 + $0x20] sm:$0xff]   ;;  %v1022_v18 = vld [vmem:[#allocation3 + $0x28] sm:$0xff]   ;;  %951 = vmatprep.subr.bf16.mxu1 %v1156_v23  ;;  %s850_s13 = sshll.u32 %s1164_s12, 4  ;;  %s851_s13 = int_to_ptr.vmem [resolvable:$true] %s850_s13 }
  0x2c   :  { %v1023_v19 = vld [vmem:[#allocation3 + $0x70] sm:$0xff]   ;;  %v1030_v21 = vld [vmem:[%s1355_s1] sm:$0xff]   ;;  %v1025_v22 = vld [vmem:[#allocation3 + $0x80] sm:$0xff]   ;;  %955 = vmatprep.mubr.msk.bf16.mxu1 %vm1157_vm1, %v1156_v23  ;;  %v60_v35 = vcvt.s32.f32 %v59_v31  ;;  %p1124_p3 = scmp.lt.s32.totalorder %s851_s13, %s851_s13 }
  0x2d   :  { %69 = vperm.xlu0 %1007, %v57_v3   ;;  %v1024_v20 = vld [vmem:[#allocation3 + $0x30] sm:$0xff]   ;;  %v1026_v24 = vld [vmem:[#allocation3 + $0x78] sm:$0xff]   ;;  %335 = vst.msk [vmem:[#allocation2 + $0x10] sm:$0xff] %vm334_vm0, %v1030_v21  ;;  %952 = vmatpush3.bf16.msra.mxu1 %v1025_v22  ;;  %v1028_v27 = vld [vmem:[%s1356_s2] sm:$0xff]   ;;  %v1161_v21 = vmov 2102212464  }
  0x2e   :  { %84 = vperm.xlu1 %1008, %v75_v5   ;;  %920 = vmatpush3.bf16.msra.mxu0 %v1014_v10  ;;  %v1027_v25 = vld [vmem:[#allocation3 + $0x38] sm:$0xff]   ;;  %v1029_v28 = vld [vmem:[#allocation3 + $0x88] sm:$0xff]   ;;  %v1033_v29 = vld [vmem:[#allocation6 + $0x4] ss:$12 sps:$4 sm:$0xff]   ;;  %v61_v38 = vadd.f32 1.0, %v60_v35 }
  0x2f   :  { %921 = vmatprep.subr.bf16.mxu0 %v1015_v11  ;;  %953 = vmatprep.subr.bf16.mxu1 %v1156_v23  ;;  %v1031_v30 = vld [vmem:[#allocation6] ss:$12 sps:$4 sm:$0xff]   ;;  %v1037_v32 = vld [vmem:[#allocation6 + $0x1c] ss:$12 sps:$4 sm:$0xff]   ;;  %v1035_v34 = vld [vmem:[#allocation6 + $0x18] ss:$12 sps:$4 sm:$0xff]  }
  0x30   :  { %525 = vmatprep.mubr.bf16.mxu0 %v1028_v27  ;;  %v1041_v36 = vld [vmem:[#allocation6 + $0x34] ss:$12 sps:$4 sm:$0xff]   ;;  %v1039_v37 = vld [vmem:[#allocation6 + $0x30] ss:$12 sps:$4 sm:$0xff]   ;;  %v76_v40 = vmul.f32 %v61_v38, %v60_v35 }
  0x31   :  { %1009 = vset.pattern.permute.xlu0 %v1155_v6  ;;  %954 = vmatpush3.bf16.msra.mxu1 %v1029_v28 }
  0x32   :  { %92 = vperm.xlu0 %1009, %v56_v2   ;;  %1010 = vset.pattern.permute.xlu1 %v1155_v6 }
  0x33   :  { %96 = vperm.xlu1 %1010, %v57_v3   ;;  %922 = vmatpush3.bf16.msra.mxu0 %v1016_v12 }
  0x34   :  { %923 = vmatprep.subr.bf16.mxu0 %v1017_v13  ;;  %755 = vmatprep.subr.bf16.mxu1 %v1033_v29  ;;  %v338_v33 = vld [vmem:[#allocation2 + $0x10] sm:$0xff] }
  0x35   :  { %956 = vmatmul.mubr.msk.bf16.vlgmr.msra.gmra.mrb[0].mxu1 %vm334_vm0, %v338_v33 }
  0x36   :  { %756 = vmatpush1.bf16.msra.mxu1 %v1031_v30  ;;  %787 = vmatprep.mubr.bf16.mxu1 %v1153_v0 }
  0x37   :  { %924 = vmatpush3.bf16.msra.mxu0 %v1018_v14  ;;  %757 = vmatprep.subr.bf16.mxu1 %v1037_v32  ;;  %v1158_v14 = vmov 683565275   ;;  %v1163_v32 = vmov 1326507024  }
  0x38   :  { %925 = vmatprep.subr.bf16.mxu0 %v1019_v15 }
  0x3a   :  { %758 = vmatpush1.bf16.msra.mxu1 %v1035_v34 }
  0x3b   :  { %926 = vmatpush3.bf16.msra.mxu0 %v1020_v16  ;;  %759 = vmatprep.subr.bf16.mxu1 %v1041_v36 }
  0x3c   :  { %927 = vmatprep.subr.bf16.mxu0 %v1021_v17  ;;  %v1159_v17 = vmov 2475754826  }
  0x3e   :  { %760 = vmatpush1.bf16.msra.mxu1 %v1039_v37 }
  0x3f   :  { %928 = vmatpush3.bf16.msra.mxu0 %v1022_v18 }
  0x40   :  { %929 = vmatprep.subr.bf16.mxu0 %v1023_v19  ;;  %v1160_v19 = vmov 2131351028  }
  0x43   :  { %930 = vmatpush3.bf16.msra.mxu0 %v1024_v20 }
  0x44   :  { %931 = vmatprep.subr.bf16.mxu0 %v1026_v24  ;;  %v1162_v24 = vmov 920167782  }
  0x47   :  { %932 = vmatpush3.bf16.msra.mxu0 %v1027_v25 }
  0x48   :  { %959 = vmatprep.subr.bf16.mxu0 %v1156_v23 }
  0xa8   :  { %v65_v39 = vpop.permute.xlu0 %64 }
  0xa9   :  { %v80_v41 = vpop.permute.xlu1 %79  ;;  %v72_v42 = vmul.f32 %v65_v39, %v61_v38 }
  0xaa   :  { %v87_v43 = vmul.f32 %v80_v41, %v76_v40 }
  0xac   :  { %v70_v44 = vpop.permute.xlu0 %69  ;;  %v89_v48 = vadd.f32 %v87_v43, %v72_v42 }
  0xad   :  { %v85_v45 = vpop.permute.xlu1 %84  ;;  %v73_v46 = vmul.f32 %v70_v44, %v61_v38 }
  0xae   :  { %v88_v47 = vmul.f32 %v85_v45, %v76_v40 }
  0xb0   :  { %v90_v50 = vadd.f32 %v88_v47, %v73_v46 }
  0xb1   :  { %v93_v49 = vpop.permute.xlu0 %92 }
  0xb2   :  { %v99_v51 = vadd.f32 %v93_v49, %v89_v48  ;;  %v97_v52 = vpop.permute.xlu1 %96 }
  0xb3   :  { %v100_v54 = vadd.f32 %v97_v52, %v90_v50 }
  0xb4   :  { %v101_v53 = vfloor.f32 %v99_v51 }
  0xb5   :  { %v102_v56 = vfloor.f32 %v100_v54 }
  0xb6   :  { %v103_v55 = vsub.f32 %v99_v51, %v101_v53 }
  0xb7   :  { %v104_v58 = vsub.f32 %v100_v54, %v102_v56 }
  0xb8   :  { %v1253_v57 = vmul.f32 6.2831855, %v103_v55 }
  0xb9   :  { %v1257_v61 = vmul.f32 6.2831855, %v104_v58 }
  0xba   :  { %v107_v59 = vand.u32 2147483647, %v1253_v57  ;;  %v110_v60 = vand.u32 2139095040, %v1253_v57  ;;  %vm109_vm0 = vcmp.lt.s32.totalorder %v1253_v57, 0 }
  0xbb   :  { %v214_v0 = vand.u32 2139095040, %v1257_v61  ;;  %v211_v2 = vand.u32 2147483647, %v1257_v61 }
  0xbc   :  { %v111_v62 = vshrl.u32 %v110_v60, 23  ;;  %v114_v63 = vand.u32 8388607, %v107_v59 }
  0xbd   :  { %v215_v3 = vshrl.u32 %v214_v0, 23  ;;  %v218_v7 = vand.u32 8388607, %v211_v2 }
  0xbe   :  { %v863_v1 = vadd.s32 4294967169, %v111_v62  ;;  %v115_v5 = vor.u32 8388608, %v114_v63 }
  0xbf   :  { %v867_v6 = vadd.s32 4294967169, %v215_v3  ;;  %v219_v16 = vor.u32 8388608, %v218_v7 }
  0xc0   :  { %v117_v4 = vadd.s32 1, %v863_v1  ;;  %v1265_v12 = vshll.u32 %v115_v5, 8 }
  0xc1   :  { %v221_v9 = vadd.s32 1, %v867_v6  ;;  %v259_v51 = vshll.u32 %v219_v16, 8 }
  0xc2   :  { %vm118_vm2 = vcmp.gt.s32.totalorder %v117_v4, 0 }
  0xc3   :  { %v119_v8 = vsel %vm118_vm2, %v117_v4, 0  ;;  %vm222_vm3 = vcmp.gt.s32.totalorder %v221_v9, 0  ;;  %vm1309_vm2 = vcmp.le.f32.partialorder %v107_v59, 0.7853982 }
  0xc4   :  { %v120_v10 = vshrl.u32 %v119_v8, 5  ;;  %v121_v11 = vand.u32 31, %v119_v8  ;;  %v223_v37 = vsel %vm222_vm3, %v221_v9, 0  ;;  %vm213_vm3 = vcmp.lt.s32.totalorder %v1257_v61, 0 }
  0xc5   :  { %v225_v40 = vand.u32 31, %v223_v37  ;;  %v224_v55 = vshrl.u32 %v223_v37, 5 }
  0xc6   :  { %v122_v13 = vsub.s32 32, %v121_v11  ;;  %v124_v15 = vshll.u32 %v1158_v14, %v121_v11  ;;  %v127_v18 = vshll.u32 %v1159_v17, %v121_v11  ;;  %v130_v20 = vshll.u32 %v1160_v19, %v121_v11 }
  0xc7   :  { %v133_v22 = vshll.u32 %v1161_v21, %v121_v11  ;;  %v136_v25 = vshll.u32 %v1162_v24, %v121_v11  ;;  %vm139_vm4 = vcmp.lt.s32.totalorder %v120_v10, 1  ;;  %vm141_vm5 = vcmp.lt.s32.totalorder %v120_v10, 3 }
  0xc8   :  { %v125_v27 = vshrl.u32 %v1159_v17, %v122_v13  ;;  %v128_v28 = vshrl.u32 %v1160_v19, %v122_v13  ;;  %v131_v29 = vshrl.u32 %v1161_v21, %v122_v13  ;;  %v123_v30 = vshrl.u32 %v1158_v14, %v122_v13 }
  0xc9   :  { %v134_v31 = vshrl.u32 %v1162_v24, %v122_v13  ;;  %v137_v33 = vshrl.u32 %v1163_v32, %v122_v13  ;;  %vm142_vm6 = vcmp.lt.s32.totalorder %v120_v10, 4  ;;  %v226_v48 = vsub.s32 32, %v225_v40 }
  0xca   :  { %v126_v34 = vor.u32 %v125_v27, %v124_v15  ;;  %v129_v35 = vor.u32 %v128_v28, %v127_v18  ;;  %v132_v36 = vor.u32 %v131_v29, %v130_v20  ;;  %vm140_vm7 = vcmp.lt.s32.totalorder %v120_v10, 2 }
  0xcb   :  { %v135_v38 = vor.u32 %v134_v31, %v133_v22  ;;  %v138_v39 = vor.u32 %v137_v33, %v136_v25  ;;  %v228_v63 = vshll.u32 %v1158_v14, %v225_v40  ;;  %v229_v0 = vshrl.u32 %v1159_v17, %v226_v48 }
  0xcc   :  { %v143_v41 = vsel %vm139_vm4, %v123_v30, %v126_v34  ;;  %v144_v42 = vsel %vm142_vm6, %v132_v36, 2102212464  ;;  %v147_v43 = vsel %vm139_vm4, %v126_v34, %v129_v35  ;;  %v151_v44 = vsel %vm139_vm4, %v129_v35, %v132_v36 }
  0xcd   :  { %v145_v45 = vsel %vm141_vm5, %v129_v35, %v144_v42  ;;  %v148_v46 = vsel %vm142_vm6, %v135_v38, 920167782  ;;  %v152_v47 = vsel %vm142_vm6, %v138_v39, 1326507024  ;;  %v231_v1 = vshll.u32 %v1159_v17, %v225_v40 }
  0xce   :  { %v149_v49 = vsel %vm141_vm5, %v132_v36, %v148_v46  ;;  %v153_v50 = vsel %vm141_vm5, %v135_v38, %v152_v47  ;;  %v146_v52 = vsel %vm140_vm7, %v143_v41, %v145_v45  ;;  %v232_v3 = vshrl.u32 %v1160_v19, %v226_v48 }
  0xcf   :  { %v150_v53 = vsel %vm140_vm7, %v147_v43, %v149_v49  ;;  %v154_v54 = vsel %vm140_vm7, %v151_v44, %v153_v50  ;;  %v234_v4 = vshll.u32 %v1160_v19, %v225_v40  ;;  %v235_v5 = vshrl.u32 %v1161_v21, %v226_v48 }
  0xd0   :  { %v1277_v56 = vmul.u32.u64.low %v1265_v12, %v154_v54  ;;  %v1278_v58 = vmul.u32.u64.high %v1265_v12, %v154_v54, %v1277_v56  ;;  %v1281_v60 = vmul.u32.u64.low %v1265_v12, %v150_v53  ;;  %v1282_v62 = vmul.u32.u64.high %v1265_v12, %v150_v53, %v1281_v60 }
  0xd1   :  { %v237_v6 = vshll.u32 %v1161_v21, %v225_v40  ;;  %v238_v7 = vshrl.u32 %v1162_v24, %v226_v48  ;;  %v230_v8 = vor.u32 %v229_v0, %v228_v63  ;;  %v233_v9 = vor.u32 %v232_v3, %v231_v1 }
  0xd2   :  { %v240_v10 = vshll.u32 %v1162_v24, %v225_v40  ;;  %v241_v11 = vshrl.u32 %v1163_v32, %v226_v48  ;;  %v162_v13 = vmul.u32 %v1265_v12, %v146_v52  ;;  %vm164_vm8 = vc.u32 %v1278_v58, %v1281_v60 }
  0xd3   :  { %v165_v15 = vadd.s32 1, %v1282_v62  ;;  %v236_v16 = vor.u32 %v235_v5, %v234_v4  ;;  %v227_v18 = vshrl.u32 %v1158_v14, %v226_v48  ;;  %v239_v17 = vor.u32 %v238_v7, %v237_v6 }
  0xd4   :  { %v242_v20 = vor.u32 %v241_v11, %v240_v10  ;;  %vm243_vm9 = vcmp.lt.s32.totalorder %v224_v55, 1  ;;  %vm245_vm10 = vcmp.lt.s32.totalorder %v224_v55, 3  ;;  %vm246_vm11 = vcmp.lt.s32.totalorder %v224_v55, 4 }
  0xd5   :  { %v166_v19 = vsel %vm164_vm8, %v165_v15, %v1282_v62  ;;  %v251_v21 = vsel %vm243_vm9, %v230_v8, %v233_v9  ;;  %v248_v24 = vsel %vm246_vm11, %v236_v16, 2102212464  ;;  %v252_v25 = vsel %vm246_vm11, %v239_v17, 920167782 }
  0xd6   :  { %v167_v22 = vadd.s32 %v166_v19, %v162_v13  ;;  %v255_v12 = vsel %vm243_vm9, %v233_v9, %v236_v16  ;;  %vm244_vm12 = vcmp.lt.s32.totalorder %v224_v55, 2  ;;  %v247_v27 = vsel %vm243_vm9, %v227_v18, %v230_v8 }
  0xd7   :  { %v253_v28 = vsel %vm245_vm10, %v236_v16, %v252_v25  ;;  %v256_v29 = vsel %vm246_vm11, %v242_v20, 1326507024  ;;  %v249_v31 = vsel %vm245_vm10, %v233_v9, %v248_v24  ;;  %v163_v56 = vadd.s32 %v1281_v60, %v1278_v58 }
  0xd8   :  { %v168_v30 = vadd.s32 536870912, %v167_v22  ;;  %v254_v32 = vsel %vm244_vm12, %v251_v21, %v253_v28  ;;  %v257_v14 = vsel %vm245_vm10, %v239_v17, %v256_v29  ;;  %v250_v39 = vsel %vm244_vm12, %v247_v27, %v249_v31 }
  0xd9   :  { %v258_v33 = vsel %vm244_vm12, %v255_v12, %v257_v14  ;;  %v1292_v34 = vmul.u32.u64.low %v259_v51, %v254_v32  ;;  %v1293_v35 = vmul.u32.u64.high %v259_v51, %v254_v32, %v1292_v34  ;;  %v266_v43 = vmul.u32 %v259_v51, %v250_v39 }
  0xda   :  { %v169_v36 = vshrl.u32 %v168_v30, 30  ;;  %v1295_v37 = vmul.u32.u64.low %v259_v51, %v258_v33  ;;  %v1296_v38 = vmul.u32.u64.high %v259_v51, %v258_v33, %v1295_v37  ;;  %vm212_vm4 = vcmp.le.f32.partialorder %v211_v2, 0.7853982 }
  0xdb   :  { %v269_v41 = vadd.s32 1, %v1293_v35  ;;  %vm199_vm11 = vweird.f32 %v1253_v57  ;;  %vm303_vm12 = vweird.f32 %v1257_v61 }
  0xdc   :  { %v170_v40 = vshll.u32 %v169_v36, 30  ;;  %vm268_vm13 = vc.u32 %v1296_v38, %v1292_v34  ;;  %v267_v16 = vadd.s32 %v1292_v34, %v1296_v38  ;;  %v193_v28 = vsub.s32 4, %v169_v36 }
  0xdd   :  { %v270_v44 = vsel %vm268_vm13, %v269_v41, %v1293_v35 }
  0xde   :  { %v171_v42 = vsub.s32 %v167_v22, %v170_v40  ;;  %v271_v46 = vadd.s32 %v270_v44, %v266_v43  ;;  %v194_v59 = vsel %vm109_vm0, %v193_v28, %v169_v36  ;;  %v873_v22 = vld [vmem:[%s1358_s4] ss:$0 sm:$0xff] }
  0xdf   :  { %v196_v33 = vsel %vm1309_vm2, 0, %v194_v59 }
  0xe0   :  { %v173_v45 = vsub.s32 0, %v171_v42  ;;  %v272_v48 = vadd.s32 536870912, %v271_v46  ;;  %v200_v38 = vadd.s32 3, %v196_v33 }
  0xe2   :  { %v864_v47 = vmin.u32 %v173_v45, %v171_v42  ;;  %v273_v50 = vshrl.u32 %v272_v48, 30 }
  0xe4   :  { %v175_v49 = vclz %v864_v47  ;;  %v274_v53 = vshll.u32 %v273_v50, 30  ;;  %v297_v32 = vsub.s32 4, %v273_v50 }
  0xe6   :  { %v865_v52 = vadd.s32 4294967294, %v175_v49  ;;  %v275_v55 = vsub.s32 %v271_v46, %v274_v53  ;;  %v298_v35 = vsel %vm213_vm3, %v297_v32, %v273_v50 }
  0xe7   :  { %v300_v39 = vsel %vm212_vm4, 0, %v298_v35  ;;  %v610_v35 = vld [vmem:[%s1360_s6] sm:$0x7]  ;;  %s1119_s6 = scalar_lea.vmem %s851_s13, 768 }
  0xe8   :  { %vm866_vm14 = vcmp.lt.s32.totalorder %v865_v52, 0  ;;  %v277_v63 = vsub.s32 0, %v275_v55  ;;  %v304_v36 = vadd.s32 3, %v300_v39  ;;  %p1120_p2 = scmp.ne.s32.totalorder %s851_s13, %s1119_s6  ;;  %p1125_p4 = scmp.lt.s32.totalorder %s1119_s6, %s1119_s6 }
  0xe9   :  { %v178_v54 = vsel %vm866_vm14, 0, %v865_v52 }
  0xea   :  { %v179_v62 = vsub.s32 32, %v178_v54  ;;  %v183_v51 = vsub.s32 4294967266, %v178_v54  ;;  %v180_v0 = vshll.u32 %v171_v42, %v178_v54  ;;  %v868_v4 = vmin.u32 %v277_v63, %v275_v55  ;;  %p1126_p5 = por %p1125_p4, %p1124_p3 }
  0xeb   :  { %v201_v42 = vand.u32 3, %v200_v38  ;;  %v305_v45 = vand.u32 3, %v304_v36 }
  0xec   :  { %v181_v1 = vshrl.u32 %v163_v56, %v179_v62  ;;  %v184_v3 = vadd.s32 127, %v183_v51  ;;  %v279_v7 = vclz %v868_v4  ;;  %v1034_v51 = vld [vmem:[#allocation6 + $0x8] ss:$12 sps:$4 sm:$0xff]   ;;  %v1046_v4 = vld [vmem:[#allocation6 + $0x50] ss:$12 sps:$4 sm:$0xff]   ;;  %p1127_p6 = pnand %p1126_p5, %p1120_p2 }
  0xed   :  { %vm203_vm5 = vcmp.eq.s32.totalorder %v201_v42, 0  ;;  %vm206_vm6 = vcmp.eq.s32.totalorder %v201_v42, 2  ;;  %vm202_vm7 = vcmp.lt.s32.totalorder %v201_v42, 2  ;;  %vm310_vm8 = vcmp.eq.s32.totalorder %v305_v45, 2 }
  0xee   :  { %v182_v5 = vor.u32 %v181_v1, %v180_v0  ;;  %v185_v6 = vshll.u32 %v184_v3, 23  ;;  %v869_v9 = vadd.s32 4294967294, %v279_v7  ;;  %vm307_vm9 = vcmp.eq.s32.totalorder %v305_v45, 0  ;;  %v1038_v0 = vld [vmem:[#allocation6 + $0x20] ss:$12 sps:$4 sm:$0xff]  }
  0xef   :  { %vm306_vm10 = vcmp.lt.s32.totalorder %v305_v45, 2  ;;  %v1042_v1 = vld [vmem:[#allocation6 + $0x38] ss:$12 sps:$4 sm:$0xff]   ;;  %v1043_v3 = vld [vmem:[#allocation6 + $0x48] ss:$12 sps:$4 sm:$0xff]  }
  0xf0   :  { %v186_v8 = vor.u32 4788187, %v185_v6  ;;  %v189_v11 = vcvt.s32.f32 %v182_v5  ;;  %vm870_vm15 = vcmp.lt.s32.totalorder %v869_v9, 0 }
  0xf1   :  { %v282_v15 = vsel %vm870_vm15, 0, %v869_v9  ;;  %v1047_v9 = vld [vmem:[#allocation6 + $0x60] ss:$12 sps:$4 sm:$0xff]  }
  0xf2   :  { %v187_v10 = vand.u32 2147483647, %v186_v8  ;;  %v283_v58 = vsub.s32 32, %v282_v15  ;;  %v287_v60 = vsub.s32 4294967266, %v282_v15  ;;  %v284_v17 = vshll.u32 %v275_v55, %v282_v15  ;;  %v1049_v8 = vld [vmem:[#allocation6 + $0x64] ss:$12 sps:$4 sm:$0xff]  }
  0xf3   :  { %v1054_v15 = vld [vmem:[#allocation6 + $0x80] ss:$12 sps:$4 sm:$0xff]  }
  0xf4   :  { %v190_v13 = vmul.f32 %v189_v11, %v187_v10  ;;  %v285_v20 = vshrl.u32 %v267_v16, %v283_v58  ;;  %v288_v19 = vadd.s32 127, %v287_v60  ;;  %v1050_v10 = vld [vmem:[#allocation6 + $0x68] ss:$12 sps:$4 sm:$0xff]   ;;  %v1055_v58 = vld [vmem:[#allocation6 + $0x90] ss:$12 sps:$4 sm:$0xff]  }
  0xf5   :  { %v1053_v11 = vld [vmem:[#allocation6 + $0x7c] ss:$12 sps:$4 sm:$0xff]   ;;  %v1057_v16 = vld [vmem:[#allocation6 + $0x94] ss:$12 sps:$4 sm:$0xff]   ;;  %v1058_v60 = vld [vmem:[#allocation6 + $0x98] ss:$12 sps:$4 sm:$0xff]  }
  0xf6   :  { %v191_v18 = vxor.u32 2147483648, %v190_v13  ;;  %v286_v24 = vor.u32 %v285_v20, %v284_v17  ;;  %v289_v25 = vshll.u32 %v288_v19, 23  ;;  %v1059_v17 = vld [vmem:[#allocation6 + $0xa8] ss:$12 sps:$4 sm:$0xff]   ;;  %v1062_v20 = vld [vmem:[#allocation6 + $0xb0] ss:$12 sps:$4 sm:$0xff]  }
  0xf8   :  { %v192_v21 = vsel %vm109_vm0, %v191_v18, %v190_v13  ;;  %v290_v27 = vor.u32 4788187, %v289_v25  ;;  %v293_v30 = vcvt.s32.f32 %v286_v24  ;;  %v1051_v13 = vld [vmem:[#allocation6 + $0x78] ss:$12 sps:$4 sm:$0xff]  }
  0xf9   :  { %v195_v12 = vsel %vm1309_vm2, %v1253_v57, %v192_v21  ;;  %v1045_v57 = vld [vmem:[#allocation6 + $0x4c] ss:$12 sps:$4 sm:$0xff]  }
  0xfa   :  { %1063 = vcosq.f32 %v195_v12  ;;  %v291_v29 = vand.u32 2147483647, %v290_v27  ;;  %761 = vmatprep.subr.bf16.mxu1 %v1045_v57  ;;  %v1061_v18 = vld [vmem:[#allocation6 + $0xac] ss:$12 sps:$4 sm:$0xff]  }
  0xfb   :  { %1065 = vsinq.f32 %v195_v12  ;;  %762 = vmatpush1.bf16.msra.mxu1 %v1043_v3 }
  0xfc   :  { %v294_v31 = vmul.f32 %v293_v30, %v291_v29  ;;  %763 = vmatprep.subr.bf16.mxu1 %v1049_v8 }
  0xfe   :  { %v295_v14 = vxor.u32 2147483648, %v294_v31 }
  0xff   :  { %764 = vmatpush1.bf16.msra.mxu1 %v1047_v9 }
 0x100   :  { %v296_v34 = vsel %vm213_vm3, %v295_v14, %v294_v31  ;;  %765 = vmatprep.subr.bf16.mxu1 %v1053_v11  ;;  %v613_v14 = vshrl.u32 %v58_v26, 7 }
 0x101   :  { %v299_v37 = vsel %vm212_vm4, %v1257_v61, %v296_v34 }
 0x102   :  { %1067 = vcosq.f32 %v299_v37  ;;  %v614_v33 = vsub.s32 0, %v613_v14  ;;  %v622_v34 = vsub.s32 2, %v613_v14 }
 0x103   :  { %1069 = vsinq.f32 %v299_v37  ;;  %766 = vmatpush1.bf16.msra.mxu1 %v1051_v13  ;;  %v618_v37 = vsub.s32 1, %v613_v14 }
 0x104   :  { %v1064_v40 = vpop.eup %1063  ;;  %767 = vmatprep.subr.bf16.mxu1 %v1057_v16  ;;  %v615_v38 = vrot.slane %v610_v35, %v614_v33  ;;  %v623_v39 = vrot.slane %v610_v35, %v622_v34 }
 0x105   :  { %v1066_v41 = vpop.eup %1065  ;;  %v207_v44 = vxor.u32 2147483648, %v1064_v40 }
 0x106   :  { %v204_v43 = vxor.u32 2147483648, %v1066_v41 }
 0x107   :  { %v208_v2 = vsel %vm206_vm6, %v207_v44, %v1066_v41  ;;  %768 = vmatpush1.bf16.msra.mxu1 %v1055_v58 }
 0x108   :  { %v205_v47 = vsel %vm203_vm5, %v1064_v40, %v204_v43  ;;  %v568_v61 = vpop.f32.mrb[0].mxu1  ;;  %769 = vmatprep.subr.bf16.mxu1 %v1061_v18  ;;  %v619_v40 = vrot.slane %v610_v35, %v618_v37 }
 0x109   :  { %v209_v52 = vsel %vm202_vm7, %v205_v47, %v208_v2  ;;  %v957_v5 = vpop.f32.mrb[1].mxu1 }
 0x10a   :  { %v210_v56 = vsel %vm199_vm11, nan, %v209_v52  ;;  %v571_v6 = vpop.f32.mrb[2].mxu1 }
 0x10b   :  { %v958_v7 = vpop.f32.mrb[3].mxu1  ;;  %770 = vmatpush1.bf16.msra.mxu1 %v1059_v17 }
 0x10c   :  { %v1068_v46 = vpop.eup %1067 }
 0x10d   :  { %v1070_v48 = vpop.eup %1069  ;;  %v311_v49 = vxor.u32 2147483648, %v1068_v46 }
 0x10e   :  { %v308_v50 = vxor.u32 2147483648, %v1070_v48 }
 0x10f   :  { %v312_v53 = vsel %vm310_vm8, %v311_v49, %v1070_v48 }
 0x110   :  { %v309_v54 = vsel %vm307_vm9, %v1068_v46, %v308_v50 }
 0x111   :  { %v313_v55 = vsel %vm306_vm10, %v309_v54, %v312_v53 }
 0x112   :  { %v314_v62 = vsel %vm303_vm12, nan, %v313_v55 }
 0x113   :  { %v315_v63 = vpack.c.bf16 %v314_v62, %v210_v56 }
 0x115   :  { %526 = vmatmul.mubr.bf16.vlgmr.msra.gmra.mrb[0].mxu0 %v315_v63 }
 0x116   :  { %960 = vmatpush3.bf16.msra.mxu0 %v1034_v51  ;;  %975 = vmatprep.mubr.msk.bf16.mxu0 %vm1157_vm1, %v1156_v23 }
 0x117   :  { %961 = vmatprep.subr.bf16.mxu0 %v1156_v23 }
 0x11a   :  { %962 = vmatpush3.bf16.msra.mxu0 %v1038_v0 }
 0x11b   :  { %963 = vmatprep.subr.bf16.mxu0 %v1156_v23 }
 0x11e   :  { %964 = vmatpush3.bf16.msra.mxu0 %v1042_v1 }
 0x11f   :  { %965 = vmatprep.subr.bf16.mxu0 %v1156_v23 }
 0x122   :  { %966 = vmatpush3.bf16.msra.mxu0 %v1046_v4 }
 0x123   :  { %967 = vmatprep.subr.bf16.mxu0 %v1156_v23 }
 0x126   :  { %968 = vmatpush3.bf16.msra.mxu0 %v1050_v10 }
 0x127   :  { %969 = vmatprep.subr.bf16.mxu0 %v1156_v23 }
 0x12a   :  { %970 = vmatpush3.bf16.msra.mxu0 %v1054_v15 }
 0x12b   :  { %971 = vmatprep.subr.bf16.mxu0 %v1156_v23 }
 0x12e   :  { %972 = vmatpush3.bf16.msra.mxu0 %v1058_v60 }
 0x12f   :  { %973 = vmatprep.subr.bf16.mxu0 %v1156_v23 }
 0x132   :  { %974 = vmatpush3.bf16.msra.mxu0 %v1062_v20 }
 0x1e8   :  { %v933_v19 = vpop.f32.mrb[0].mxu0 }
 0x1e9   :  { %v934_v21 = vpop.f32.mrb[1].mxu0 }
 0x1ea   :  { %v935_v24 = vadd.f32 %v934_v21, %v933_v19  ;;  %v936_v25 = vpop.f32.mrb[2].mxu0 }
 0x1eb   :  { %v937_v12 = vpop.f32.mrb[3].mxu0 }
 0x1ec   :  { %v528_v27 = vadd.f32 %v935_v24, %v873_v22  ;;  %v938_v28 = vadd.f32 %v937_v12, %v936_v25 }
 0x1ee   :  { %v569_v29 = vadd.f32 %v568_v61, %v528_v27  ;;  %v531_v30 = vadd.f32 %v938_v28, %v873_v22 }
 0x1f0   :  { %v572_v31 = vadd.f32 %v571_v6, %v531_v30  ;;  %1071 = vtanh.f32 %v569_v29 }
 0x1f2   :  { %1073 = vtanh.f32 %v572_v31 }
 0x1fa   :  { %v1072_v32 = vpop.eup %1071 }
 0x1fc   :  { %v1074_v23 = vpop.eup %1073 }
 0x1fd   :  { %v577_v59 = vpack.c.bf16 %v1074_v23, %v1072_v32 }
 0x1ff   :  { %788 = vmatmul.mubr.bf16.vlgmr.msra.gmra.mrb[4].mxu1 %v577_v59  ;;  %976 = vmatmul.mubr.bf16.vlgmr.msra.gmra.mrb[4].mxu0 %v577_v59 }
 0x2d2   :  { %v789_v41 = vpop.f32.mrb[4].mxu1  ;;  %v832_v36 = vpop.f32.mrb[4].mxu0 }
 0x2d3   :  { %v790_v42 = vadd.f32 %v789_v41, %v615_v38  ;;  %v833_v43 = vadd.f32 %v832_v36, %v623_v39  ;;  %v791_v44 = vpop.f32.mrb[5].mxu1  ;;  %v977_v45 = vpop.f32.mrb[5].mxu0 }
 0x2d4   :  { %v792_v46 = vadd.f32 %v791_v44, %v619_v40  ;;  %v793_v26 = vpop.f32.mrb[6].mxu1  ;;  %v835_v47 = vpop.f32.mrb[6].mxu0 }
 0x2d5   :  { %839 = vst [vmem:[#allocation8] sm:$0xff] %v790_v42  ;;  %841 = vst [vmem:[#allocation8 + $0x10] sm:$0xff] %v833_v43  ;;  %v794_v2 = vadd.f32 %v793_v26, %v615_v38  ;;  %v836_v48 = vadd.f32 %v835_v47, %v623_v39  ;;  %v795_v49 = vpop.f32.mrb[7].mxu1  ;;  %v978_v50 = vpop.f32.mrb[7].mxu0 }
 0x2d6   :  { %840 = vst [vmem:[#allocation8 + $0x8] sm:$0xff] %v792_v46  ;;  %v796_v52 = vadd.f32 %v795_v49, %v619_v40 }
 0x2d7   :  { %842 = vst [vmem:[#allocation8 + $0x18] sm:$0xff] %v794_v2  ;;  %844 = vst [vmem:[#allocation8 + $0x28] sm:$0xff] %v836_v48 }
 0x2d8   :  { %843 = vst [vmem:[#allocation8 + $0x20] sm:$0xff] %v796_v52 }
 0x2d9   :  { %1130 = shalt.err (!%p1127_p6)
}
 0x2da   :  { %s1131_s16 = scalar_lea.hbm %s1361_s7, 768 }
 0x2db   :  { %p1132_p7 = scmp.ne.s32.totalorder %s1361_s7, %s1131_s16  ;;  %p1135_p8 = scmp.lt.u32.totalorder %s1131_s16, %s1361_s7 }
 0x2dd   :  { %p1137_p9 = pnand %p1135_p8, %p1132_p7 }
 0x2df   :  { %1140 = shalt.err (!%p1137_p9)
}
 0x2e0   :  { %s1165_s21 = smov 384   ;;  %s1166_s22 = smov 24  }
 0x2e1   :  { %856 = dma.vmem_to_hbm [thread:$0]  %s851_s13, 768, %s1361_s7, [#allocation5], %s1165_s21, %s1165_s21, %s1166_s22  }
 0x2e2   :  { %1145 = dma.done.wait [#allocation5], 768  }
 0x2e3   :  { %1146 = vsyncadd [#allocation5], 4294966528 }
 0x2e4   :  { %860 = vsyncpa [#allocation4], 1 }
 0x2e5   :  { %861 = vsyncpa [#allocation7], 1 }
 0x2e6   :  { %862 = vsyncpa [#allocation5], 1 }

</bundles_post_ra>
